<compile_context>
chip_gen: v5e
topology: v5e:2x2
jax: 0.10.0
libtpu: 0.0.40
codegen_flags: <defaults>
</compile_context>

<pallas_src>
import functools
import math

import jax
import jax.numpy as jnp
from jax.experimental import pallas as pl
from jax.experimental.pallas import tpu as pltpu

_INV_SQRT2 = 1.0 / math.sqrt(2.0)


def _cdiv(a, b):
    return (a + b - 1) // b


def _round_up(v, m):
    return _cdiv(v, m) * m


def _gelu(h, approximate):
    if approximate:
        # tanh GELU lowers to EUP (frees VALU slots); not bit-identical to torch.nn.GELU().
        return jax.nn.gelu(h, approximate=True)
    # Exact GELU: matches torch.nn.GELU() default.
    return 0.5 * h * (1.0 + jax.lax.erf(h * _INV_SQRT2))


def _ffn_kernel_resident(x_ref, w1_ref, b1_ref, w2_ref, b2_ref, o_ref, *, approximate):
    # Single hidden slab (weights resident): no accumulator round-trip.
    h = jnp.dot(x_ref[...], w1_ref[...], preferred_element_type=jnp.float32)
    h = _gelu(h + b1_ref[...], approximate)
    # TODO(synk): dropout omitted (eval-mode forward; training-mode dropout is stochastic).
    out = jnp.dot(h.astype(w2_ref.dtype), w2_ref[...], preferred_element_type=jnp.float32)
    o_ref[...] = (out + b2_ref[...]).astype(o_ref.dtype)


def _ffn_kernel_tiled(x_ref, w1_ref, b1_ref, w2_ref, b2_ref, o_ref, acc_ref, *, approximate):
    # Hidden axis tiled: f32 VMEM accumulator with pl.when init/finalize.
    k = pl.program_id(1)

    @pl.when(k == 0)
    def _():
        acc_ref[...] = jnp.zeros_like(acc_ref)

    h = jnp.dot(x_ref[...], w1_ref[...], preferred_element_type=jnp.float32)
    h = _gelu(h + b1_ref[...], approximate)
    acc_ref[...] += jnp.dot(h.astype(w2_ref.dtype), w2_ref[...],
                            preferred_element_type=jnp.float32)

    @pl.when(k == pl.num_programs(1) - 1)
    def _():
        o_ref[...] = (acc_ref[...] + b2_ref[...]).astype(o_ref.dtype)


def _vmem_budget_bytes():
    """Per-generation VMEM budget for pipeline buffers (leaves compiler headroom)."""
    cap = 128 * 1024 * 1024
    try:
        info = pltpu.get_tpu_info()
        cap = int(getattr(info, "vmem_capacity_bytes", cap)) or cap
    except Exception:
        pass
    if cap <= 64 * 1024 * 1024:
        # v7x-class: 64 MiB per TensorCore -> stay well clear of the ceiling.
        return min(cap - 16 * 1024 * 1024, 48 * 1024 * 1024)
    # v5e / v6e: 128 MiB physical -> use most of it.
    return min(cap - 28 * 1024 * 1024, 100 * 1024 * 1024)


def feed_forward(x, w1, b1, w2, b2, *, compute_dtype=None, approximate_gelu=False,
                 tm=None, th=None):
    """Fredformer FeedForward (eval mode): gelu(x @ w1 + b1) @ w2 + b2.

    x: (..., dim); w1: (dim, hidden); w2: (hidden, dim); b1: (hidden,); b2: (dim,).
    Returns an array with x's shape and dtype.

    compute_dtype: dtype fed to the MXU.  Default: bf16 when x is f32 (accumulation,
    bias add and GELU stay in f32 inside the kernel).  Pass jnp.float32 for exact f32.
    """
    orig_shape = x.shape
    out_dtype = x.dtype
    dim = orig_shape[-1]
    hidden = w1.shape[1]
    assert w1.shape == (dim, hidden)
    assert w2.shape == (hidden, dim)
    assert b1.shape == (hidden,)
    assert b2.shape == (dim,)

    if compute_dtype is None:
        compute_dtype = jnp.bfloat16 if x.dtype == jnp.float32 else x.dtype
    compute_dtype = jnp.dtype(compute_dtype)

    x2 = x.reshape(-1, dim)
    M = x2.shape[0]

    # ---- Lane-dense padding: kernel-visible last dims are multiples of 128. ----
    # Zero padding is mathematically inert: gelu(0 + 0) = 0 and padded w2 rows are 0.
    dp = _round_up(dim, 128)
    hp = _round_up(hidden, 128)
    if dp != dim:
        x2 = jnp.pad(x2, ((0, 0), (0, dp - dim)))
    if dp != dim or hp != hidden:
        w1 = jnp.pad(w1, ((0, dp - dim), (0, hp - hidden)))
        w2 = jnp.pad(w2, ((0, hp - hidden), (0, dp - dim)))
        b1 = jnp.pad(b1, (0, hp - hidden))
        b2 = jnp.pad(b2, (0, dp - dim))

    x2 = x2.astype(compute_dtype)
    w1 = w1.astype(compute_dtype)
    w2 = w2.astype(compute_dtype)
    b1_2d = b1.reshape(1, hp).astype(jnp.float32)   # biases stay f32 (f32 epilogue)
    b2_2d = b2.reshape(1, dp).astype(jnp.float32)

    a_item = x2.dtype.itemsize
    w_item = w1.dtype.itemsize
    o_item = jnp.dtype(out_dtype).itemsize

    budget = _vmem_budget_bytes()
    row_align = 16 if a_item < 4 else 8            # dtype-aware row-tile alignment

    def _run(weight_buffers):
        # ------------------ budget-driven tile selection ------------------
        full_w_bytes = weight_buffers * (2 * dp * hp * w_item + 8 * (hp + dp) * 4)
        force_tiled = th is not None and _round_up(th, 128) < hp

        if full_w_bytes <= budget // 2 and not force_tiled:
            # Weights fully resident: fetched from HBM exactly once.
            th_sel = hp
            weight_vmem = full_w_bytes
            # per output row: x + out (double-buffered) + f32 h + f32 epilogue temps
            per_row = 2 * dp * a_item + 2 * dp * o_item + hp * 4 + 2 * dp * 4
            tm_cap = tm if tm else 256
        else:
            # Hidden tiling: pick the largest 128-multiple slab fitting ~half the budget.
            th_sel = min(_round_up(th if th else 512, 128), hp)
            while hp % th_sel:
                th_sel -= 128
            while th_sel > 128 and (
                    4 * dp * th_sel * w_item + 2 * 8 * (th_sel + dp) * 4) > budget // 2:
                th_sel -= 128
                while hp % th_sel:
                    th_sel -= 128
            weight_vmem = 4 * dp * th_sel * w_item + 2 * 8 * (th_sel + dp) * 4
            per_row = 2 * dp * a_item + 2 * dp * o_item + th_sel * 4 + 3 * dp * 4
            tm_cap = tm if tm else 512   # bigger row tile -> higher weight-stream intensity

        tm_budget = (budget - weight_vmem) // per_row
        tm_sel = max(row_align, min(tm_cap, tm_budget, _round_up(M, row_align)))
        if M > row_align:
            # Guarantee >= 2 row blocks so the "parallel" M axis shards across v7x's 2 TCs.
            tm_sel = min(tm_sel, _round_up(_cdiv(M, 2), row_align))
        tm_sel = max(row_align, (tm_sel // row_align) * row_align)

        nm = _cdiv(M, tm_sel)           # partial last M block handled by Pallas
        nh = hp // th_sel

        # ------------------ specs / kernels ------------------
        w_kwargs = {}
        if nh == 1 and weight_buffers == 1:
            # Constant block index: a single buffer suffices (halves weight VMEM).
            w_kwargs = dict(pipeline_mode=pl.Buffered(1))

        if nh == 1:
            in_specs = [
                pl.BlockSpec((tm_sel, dp), lambda i: (i, 0)),           # x row tile
                pl.BlockSpec((dp, hp), lambda i: (0, 0), **w_kwargs),   # w1 (resident)
                pl.BlockSpec((1, hp), lambda i: (0, 0), **w_kwargs),    # b1
                pl.BlockSpec((hp, dp), lambda i: (0, 0), **w_kwargs),   # w2 (resident)
                pl.BlockSpec((1, dp), lambda i: (0, 0), **w_kwargs),    # b2
            ]
            out_specs = pl.BlockSpec((tm_sel, dp), lambda i: (i, 0))
            grid = (nm,)
            scratch = []
            kernel = functools.partial(_ffn_kernel_resident, approximate=approximate_gelu)
            dim_sem = ("parallel",)
        else:
            def serp(i, k):
                # Serpentine over the hidden axis: k for even row tiles, nh-1-k for odd,
                # so the boundary slab is reused across consecutive row tiles.
                r = i % 2
                return k + r * (nh - 1 - 2 * k)

            in_specs = [
                pl.BlockSpec((tm_sel, dp), lambda i, k: (i, 0)),             # x row tile
                pl.BlockSpec((dp, th_sel), lambda i, k: (0, serp(i, k))),    # w1 slab
                pl.BlockSpec((1, th_sel), lambda i, k: (0, serp(i, k))),     # b1 slab
                pl.BlockSpec((th_sel, dp), lambda i, k: (serp(i, k), 0)),    # w2 slab
                pl.BlockSpec((1, dp), lambda i, k: (0, 0)),                  # b2
            ]
            out_specs = pl.BlockSpec((tm_sel, dp), lambda i, k: (i, 0))
            grid = (nm, nh)
            scratch = [pltpu.VMEM((tm_sel, dp), jnp.float32)]
            kernel = functools.partial(_ffn_kernel_tiled, approximate=approximate_gelu)
            dim_sem = ("parallel", "arbitrary")

        weight_bytes = 2 * dp * hp * w_item + (hp + dp) * 4
        cost = pl.CostEstimate(
            flops=int(4 * M * dp * hp),                       # two matmuls
            transcendentals=int(M * hp),                      # erf/tanh per activation
            bytes_accessed=int(M * dp * a_item + M * dp * o_item
                               + weight_bytes * (nm if nh > 1 else 1)),
        )

        return pl.pallas_call(
            kernel,
            out_shape=jax.ShapeDtypeStruct((M, dp), out_dtype),
            grid_spec=pltpu.PrefetchScalarGridSpec(
                num_scalar_prefetch=0,
                grid=grid,
                in_specs=in_specs,
                out_specs=out_specs,
                scratch_shapes=scratch,
            ),
            compiler_params=pltpu.CompilerParams(
                dimension_semantics=dim_sem,
                vmem_limit_bytes=int(budget),
            ),
            cost_estimate=cost,
        )(x2, w1, b1_2d, w2, b2_2d)

    try:
        out = _run(1)          # single-buffered resident weights (preferred)
    except Exception:
        out = _run(2)          # conservative fallback: default double buffering

    if dp != dim:
        out = out[:, :dim]
    return out.reshape(orig_shape)


def init_params(key, dim, hidden_dim, dtype=jnp.float32):
    """Deterministic init mimicking torch.nn.Linear defaults (uniform +-1/sqrt(fan_in))."""
    k1, k2, k3, k4 = jax.random.split(key, 4)
    bound1 = 1.0 / math.sqrt(dim)
    bound2 = 1.0 / math.sqrt(hidden_dim)
    w1 = jax.random.uniform(k1, (dim, hidden_dim), dtype, -bound1, bound1)
    b1 = jax.random.uniform(k2, (hidden_dim,), dtype, -bound1, bound1)
    w2 = jax.random.uniform(k3, (hidden_dim, dim), dtype, -bound2, bound2)
    b2 = jax.random.uniform(k4, (dim,), dtype, -bound2, bound2)
    return w1, b1, w2, b2


def reference_feed_forward(x, w1, b1, w2, b2):
    h = x @ w1 + b1
    h = jax.nn.gelu(h, approximate=False)
    return h @ w2 + b2


if __name__ == "__main__":
    key = jax.random.PRNGKey(0)
    k_x, k_p = jax.random.split(key)

    # Small shapes consistent with the module's usage: (batch, seq, dim)
    batch, seq, dim, hidden = 2, 8, 32, 64
    x = jax.random.normal(k_x, (batch, seq, dim), dtype=jnp.float32)
    w1, b1, w2, b2 = init_params(k_p, dim, hidden)
    ref = reference_feed_forward(x, w1, b1, w2, b2)

    # 1) Exact f32 path (parity with torch.nn.Linear + torch.nn.GELU in f32).
    out_f32 = jax.block_until_ready(
        feed_forward(x, w1, b1, w2, b2, compute_dtype=jnp.float32))
    assert out_f32.shape == x.shape and out_f32.dtype == x.dtype
    assert jnp.allclose(out_f32, ref, atol=1e-5, rtol=1e-5), "f32 path mismatch"

    # 2) Default fast path: bf16 MXU operands, f32 accumulation / bias / GELU.
    out_bf16 = jax.block_until_ready(feed_forward(x, w1, b1, w2, b2))
    assert out_bf16.shape == x.shape and out_bf16.dtype == x.dtype
    assert jnp.allclose(out_bf16, ref, atol=5e-2, rtol=5e-2), "bf16 path mismatch"

    # 3) Force the hidden-tiled (serpentine + accumulator) path to validate it too.
    hidden2 = 256
    w1b, b1b, w2b, b2b = init_params(jax.random.split(k_p)[0], dim, hidden2)
    ref2 = reference_feed_forward(x, w1b, b1b, w2b, b2b)
    out_tiled = jax.block_until_ready(
        feed_forward(x, w1b, b1b, w2b, b2b, compute_dtype=jnp.float32, th=128))
    assert out_tiled.shape == x.shape and out_tiled.dtype == x.dtype
    assert jnp.allclose(out_tiled, ref2, atol=1e-5, rtol=1e-5), "tiled path mismatch"

    print("KERNEL_OK")
</pallas_src>

<mosaic_0001>
module attributes {stable_mosaic.version = 11 : i64} {
  func.func @_ffn_kernel_resident(%arg0: i32, %arg1: memref<8x128xf32, #tpu.memory_space<vmem>>, %arg2: memref<128x128xf32, #tpu.memory_space<vmem>>, %arg3: memref<1x128xf32, #tpu.memory_space<vmem>>, %arg4: memref<128x128xf32, #tpu.memory_space<vmem>>, %arg5: memref<1x128xf32, #tpu.memory_space<vmem>>, %arg6: memref<8x128xf32, #tpu.memory_space<vmem>>) attributes {dimension_semantics = [#tpu.dimension_semantics<parallel>], iteration_bounds = array<i64: 2>, scalar_prefetch = 0 : i64, scratch_operands = 0 : i64, tpu.core_type = #tpu.core_type<tc>, window_params = [{transform_indices = @transform_0, window_bounds = array<i64: 8, 128>}, {pipeline_mode = #tpu.pipeline_mode<synchronous>, transform_indices = @transform_1, window_bounds = array<i64: 128, 128>}, {pipeline_mode = #tpu.pipeline_mode<synchronous>, transform_indices = @transform_2, window_bounds = array<i64: 1, 128>}, {pipeline_mode = #tpu.pipeline_mode<synchronous>, transform_indices = @transform_3, window_bounds = array<i64: 128, 128>}, {pipeline_mode = #tpu.pipeline_mode<synchronous>, transform_indices = @transform_4, window_bounds = array<i64: 1, 128>}, {transform_indices = @transform_5, window_bounds = array<i64: 8, 128>}]} {
    %c0 = arith.constant 0 : index
    %c0_0 = arith.constant 0 : index
    %0 = vector.load %arg1[%c0, %c0_0] : memref<8x128xf32, #tpu.memory_space<vmem>>, vector<8x128xf32>
    %c0_1 = arith.constant 0 : index
    %c0_2 = arith.constant 0 : index
    %1 = vector.load %arg2[%c0_1, %c0_2] : memref<128x128xf32, #tpu.memory_space<vmem>>, vector<128x128xf32>
    %cst = arith.constant dense<0.000000e+00> : vector<8x128xf32>
    %2 = tpu.matmul %0, %1, %cst {dimension_numbers = #tpu.dot_dimension_numbers<[1], [0], [0], [1], [0, 0, 1, 1], [], []>} : vector<8x128xf32>, vector<128x128xf32>, vector<8x128xf32> -> vector<8x128xf32>
    %c0_3 = arith.constant 0 : index
    %c0_4 = arith.constant 0 : index
    %3 = vector.load %arg3[%c0_3, %c0_4] : memref<1x128xf32, #tpu.memory_space<vmem>>, vector<1x128xf32>
    %4 = vector.broadcast %3 : vector<1x128xf32> to vector<8x128xf32>
    %5 = arith.addf %2, %4 : vector<8x128xf32>
    %cst_5 = arith.constant 5.000000e-01 : f32
    %6 = vector.broadcast %cst_5 : f32 to vector<8x128xf32>
    %7 = arith.mulf %6, %5 : vector<8x128xf32>
    %cst_6 = arith.constant 0.707106769 : f32
    %8 = vector.broadcast %cst_6 : f32 to vector<8x128xf32>
    %9 = arith.mulf %5, %8 : vector<8x128xf32>
    %10 = math.erf %9 : vector<8x128xf32>
    %cst_7 = arith.constant 1.000000e+00 : f32
    %11 = vector.broadcast %cst_7 : f32 to vector<8x128xf32>
    %12 = arith.addf %11, %10 : vector<8x128xf32>
    %13 = arith.mulf %7, %12 : vector<8x128xf32>
    %c0_8 = arith.constant 0 : index
    %c0_9 = arith.constant 0 : index
    %14 = vector.load %arg4[%c0_8, %c0_9] : memref<128x128xf32, #tpu.memory_space<vmem>>, vector<128x128xf32>
    %cst_10 = arith.constant dense<0.000000e+00> : vector<8x128xf32>
    %15 = tpu.matmul %13, %14, %cst_10 {dimension_numbers = #tpu.dot_dimension_numbers<[1], [0], [0], [1], [0, 0, 1, 1], [], []>} : vector<8x128xf32>, vector<128x128xf32>, vector<8x128xf32> -> vector<8x128xf32>
    %c0_11 = arith.constant 0 : index
    %c0_12 = arith.constant 0 : index
    %16 = vector.load %arg5[%c0_11, %c0_12] : memref<1x128xf32, #tpu.memory_space<vmem>>, vector<1x128xf32>
    %17 = vector.broadcast %16 : vector<1x128xf32> to vector<8x128xf32>
    %18 = arith.addf %15, %17 : vector<8x128xf32>
    %c0_13 = arith.constant 0 : index
    %c0_14 = arith.constant 0 : index
    %19 = vector.load %arg6[%c0_13, %c0_14] : memref<8x128xf32, #tpu.memory_space<vmem>>, vector<8x128xf32>
    tpu.vector_store %arg6[%c0_13, %c0_14], %18 {strides = array<i32>} : memref<8x128xf32, #tpu.memory_space<vmem>>, vector<8x128xf32>,
    return
  }
  func.func @transform_0(%arg0: i32) -> (i32, i32) {
    %c0_i32 = arith.constant 0 : i32
    %c0_i32_0 = arith.constant 0 : i32
    return %arg0, %c0_i32 : i32, i32
  }
  func.func @transform_1(%arg0: i32) -> (i32, i32) {
    %c0_i32 = arith.constant 0 : i32
    %c0_i32_0 = arith.constant 0 : i32
    %c0_i32_1 = arith.constant 0 : i32
    return %c0_i32, %c0_i32_0 : i32, i32
  }
  func.func @transform_2(%arg0: i32) -> (i32, i32) {
    %c0_i32 = arith.constant 0 : i32
    %c0_i32_0 = arith.constant 0 : i32
    %c0_i32_1 = arith.constant 0 : i32
    return %c0_i32, %c0_i32_0 : i32, i32
  }
  func.func @transform_3(%arg0: i32) -> (i32, i32) {
    %c0_i32 = arith.constant 0 : i32
    %c0_i32_0 = arith.constant 0 : i32
    %c0_i32_1 = arith.constant 0 : i32
    return %c0_i32, %c0_i32_0 : i32, i32
  }
  func.func @transform_4(%arg0: i32) -> (i32, i32) {
    %c0_i32 = arith.constant 0 : i32
    %c0_i32_0 = arith.constant 0 : i32
    %c0_i32_1 = arith.constant 0 : i32
    return %c0_i32, %c0_i32_0 : i32, i32
  }
  func.func @transform_5(%arg0: i32) -> (i32, i32) {
    %c0_i32 = arith.constant 0 : i32
    %c0_i32_0 = arith.constant 0 : i32
    return %arg0, %c0_i32 : i32, i32
  }
}

module attributes {stable_mosaic.version = 11 : i64} {
  func.func @_ffn_kernel_resident(%arg0: i32, %arg1: memref<8x128xf32, #tpu.memory_space<vmem>>, %arg2: memref<128x128xf32, #tpu.memory_space<vmem>>, %arg3: memref<1x128xf32, #tpu.memory_space<vmem>>, %arg4: memref<128x128xf32, #tpu.memory_space<vmem>>, %arg5: memref<1x128xf32, #tpu.memory_space<vmem>>, %arg6: memref<8x128xf32, #tpu.memory_space<vmem>>) attributes {dimension_semantics = [#tpu.dimension_semantics<parallel>], iteration_bounds = array<i64: 2>, scalar_prefetch = 0 : i64, scratch_operands = 0 : i64, tpu.core_type = #tpu.core_type<tc>, window_params = [{transform_indices = @transform_0, window_bounds = array<i64: 8, 128>}, {pipeline_mode = #tpu.pipeline_mode<synchronous>, transform_indices = @transform_1, window_bounds = array<i64: 128, 128>}, {pipeline_mode = #tpu.pipeline_mode<synchronous>, transform_indices = @transform_2, window_bounds = array<i64: 1, 128>}, {pipeline_mode = #tpu.pipeline_mode<synchronous>, transform_indices = @transform_3, window_bounds = array<i64: 128, 128>}, {pipeline_mode = #tpu.pipeline_mode<synchronous>, transform_indices = @transform_4, window_bounds = array<i64: 1, 128>}, {transform_indices = @transform_5, window_bounds = array<i64: 8, 128>}]} {
    %c0 = arith.constant 0 : index
    %c0_0 = arith.constant 0 : index
    %0 = vector.load %arg1[%c0, %c0_0] : memref<8x128xf32, #tpu.memory_space<vmem>>, vector<8x128xf32>
    %c0_1 = arith.constant 0 : index
    %c0_2 = arith.constant 0 : index
    %1 = vector.load %arg2[%c0_1, %c0_2] : memref<128x128xf32, #tpu.memory_space<vmem>>, vector<128x128xf32>
    %cst = arith.constant dense<0.000000e+00> : vector<8x128xf32>
    %2 = tpu.matmul %0, %1, %cst {dimension_numbers = #tpu.dot_dimension_numbers<[1], [0], [0], [1], [0, 0, 1, 1], [], []>} : vector<8x128xf32>, vector<128x128xf32>, vector<8x128xf32> -> vector<8x128xf32>
    %c0_3 = arith.constant 0 : index
    %c0_4 = arith.constant 0 : index
    %3 = vector.load %arg3[%c0_3, %c0_4] : memref<1x128xf32, #tpu.memory_space<vmem>>, vector<1x128xf32>
    %4 = vector.broadcast %3 : vector<1x128xf32> to vector<8x128xf32>
    %5 = arith.addf %2, %4 : vector<8x128xf32>
    %cst_5 = arith.constant 5.000000e-01 : f32
    %6 = vector.broadcast %cst_5 : f32 to vector<8x128xf32>
    %7 = arith.mulf %6, %5 : vector<8x128xf32>
    %cst_6 = arith.constant 0.707106769 : f32
    %8 = vector.broadcast %cst_6 : f32 to vector<8x128xf32>
    %9 = arith.mulf %5, %8 : vector<8x128xf32>
    %10 = math.erf %9 : vector<8x128xf32>
    %cst_7 = arith.constant 1.000000e+00 : f32
    %11 = vector.broadcast %cst_7 : f32 to vector<8x128xf32>
    %12 = arith.addf %11, %10 : vector<8x128xf32>
    %13 = arith.mulf %7, %12 : vector<8x128xf32>
    %c0_8 = arith.constant 0 : index
    %c0_9 = arith.constant 0 : index
    %14 = vector.load %arg4[%c0_8, %c0_9] : memref<128x128xf32, #tpu.memory_space<vmem>>, vector<128x128xf32>
    %cst_10 = arith.constant dense<0.000000e+00> : vector<8x128xf32>
    %15 = tpu.matmul %13, %14, %cst_10 {dimension_numbers = #tpu.dot_dimension_numbers<[1], [0], [0], [1], [0, 0, 1, 1], [], []>} : vector<8x128xf32>, vector<128x128xf32>, vector<8x128xf32> -> vector<8x128xf32>
    %c0_11 = arith.constant 0 : index
    %c0_12 = arith.constant 0 : index
    %16 = vector.load %arg5[%c0_11, %c0_12] : memref<1x128xf32, #tpu.memory_space<vmem>>, vector<1x128xf32>
    %17 = vector.broadcast %16 : vector<1x128xf32> to vector<8x128xf32>
    %18 = arith.addf %15, %17 : vector<8x128xf32>
    %c0_13 = arith.constant 0 : index
    %c0_14 = arith.constant 0 : index
    %19 = vector.load %arg6[%c0_13, %c0_14] : memref<8x128xf32, #tpu.memory_space<vmem>>, vector<8x128xf32>
    tpu.vector_store %arg6[%c0_13, %c0_14], %18 {strides = array<i32>} : memref<8x128xf32, #tpu.memory_space<vmem>>, vector<8x128xf32>,
    return
  }
  func.func @transform_0(%arg0: i32) -> (i32, i32) {
    %c0_i32 = arith.constant 0 : i32
    %c0_i32_0 = arith.constant 0 : i32
    return %arg0, %c0_i32 : i32, i32
  }
  func.func @transform_1(%arg0: i32) -> (i32, i32) {
    %c0_i32 = arith.constant 0 : i32
    %c0_i32_0 = arith.constant 0 : i32
    %c0_i32_1 = arith.constant 0 : i32
    return %c0_i32, %c0_i32_0 : i32, i32
  }
  func.func @transform_2(%arg0: i32) -> (i32, i32) {
    %c0_i32 = arith.constant 0 : i32
    %c0_i32_0 = arith.constant 0 : i32
    %c0_i32_1 = arith.constant 0 : i32
    return %c0_i32, %c0_i32_0 : i32, i32
  }
  func.func @transform_3(%arg0: i32) -> (i32, i32) {
    %c0_i32 = arith.constant 0 : i32
    %c0_i32_0 = arith.constant 0 : i32
    %c0_i32_1 = arith.constant 0 : i32
    return %c0_i32, %c0_i32_0 : i32, i32
  }
  func.func @transform_4(%arg0: i32) -> (i32, i32) {
    %c0_i32 = arith.constant 0 : i32
    %c0_i32_0 = arith.constant 0 : i32
    %c0_i32_1 = arith.constant 0 : i32
    return %c0_i32, %c0_i32_0 : i32, i32
  }
  func.func @transform_5(%arg0: i32) -> (i32, i32) {
    %c0_i32 = arith.constant 0 : i32
    %c0_i32_0 = arith.constant 0 : i32
    return %arg0, %c0_i32 : i32, i32
  }
}

</mosaic_0001>

<bundles_post_ra>
// kernel: tpu_custom_call.1
= control target key start
LH: loop header
LB: loop body
LE: loop exit
PB: predicated region body
PF: predicated region fallthrough
CT: control target
= control target key end

     0   :  { %10 = vsyncpa [#allocation3], 0  ;;  %s950_s0 = inlined_call_operand.hbm [shape: f32[16,128], index: 0, kind: input, shape index: {}]   ;;  %s951_s1 = inlined_call_operand.hbm [shape: f32[128,128], index: 1, kind: input, shape index: {}]   ;;  %s952_s2 = inlined_call_operand.vmem [shape: f32[1,128], index: 2, kind: input, shape index: {}]   ;;  %s953_s3 = inlined_call_operand.hbm [shape: f32[128,128], index: 3, kind: input, shape index: {}]   ;;  %s954_s4 = inlined_call_operand.vmem [shape: f32[1,128], index: 4, kind: input, shape index: {}]   ;;  %s955_s5 = inlined_call_operand.hbm [shape: f32[16,128], index: 5, kind: output, shape index: {}]  }
   0x1   :  { %12 = vsyncpa [#allocation3 + $0x1], 0 }
   0x2   :  { %13 = vsyncpa [#allocation6], 0 }
   0x3   :  { %14 = vsyncpa [#allocation4], 0 }
   0x4   :  { %16 = vsyncpa [#allocation4 + $0x1], 0  ;;  %s792_s18 = smov 0   ;;  %s794_s19 = smov 0  }
   0x5   :  { %s796_s20 = smov 0   ;;  %s798_s21 = smov 0  }
   0x6 LB: > { %s174_s24 = sshll.u32 %s951_s1, 4  ;;  %s816_s25 = sadd.s32 4294967295, %s756_s21   ;;  %s756_s21 = sphi %s798_s21, %s966_s21   ;;  %s752_s20 = sphi %s796_s20, %s965_s20   ;;  %s748_s19 = sphi %s794_s19, %s964_s19   ;;  %s744_s18 = sphi %s792_s18, %s963_s18   ;;  %s175_s24 = int_to_ptr.hbm [resolvable:$true] %s174_s24 }
   0x7   : > { %p507_p0 = scmp.ge.s32.totalorder %s756_s21, 1  ;;  %p43_p1 = scmp.eq.s32.totalorder %s816_s25, 0 }
   0x8   : > { %p163_p2 = scmp.lt.s32.totalorder %s756_s21, 3  ;;  %s758_s27 = smov [#allocation5]  }
   0x9   : > { %s176_s28 = sshll.u32 %s758_s27, 4  ;;  %s191_s6 = sshll.u32 %s953_s3, 4  ;;  %s177_s28 = int_to_ptr.vmem [resolvable:$true] %s176_s28  ;;  %s192_s6 = int_to_ptr.hbm [resolvable:$true] %s191_s6 }
   0xa   : > { %p821_p3 = pnand %p507_p0, %p163_p2  ;;  %s759_s7 = smov [#allocation7]  }
   0xb   : > { %s193_s8 = sshll.u32 %s759_s7, 4  ;;  %s760_s9 = smov 128   ;;  %s194_s8 = int_to_ptr.vmem [resolvable:$true] %s193_s8 }
   0xc   : > { %p535_p4 = pneg %p821_p3  ;;  %s761_s10 = smov 8  }
   0xd   : > { %s506_s11 = sadd.s32 4294967294, %s756_s21   ;;  %s835_s12 = sadd.s32 1, %s756_s21  }
   0xe   : > { %p536_p6 = pnand %p535_p4, %p43_p1  ;;  %s26_s13 = ssub.s32 %s756_s21, %s835_s12 }
   0xf   : > { %s29_s14 = sadd.s32 1, %s752_s20  ;;  %p27_p7 = scmp.eq.s32.totalorder %s26_s13, 0 }
  0x10   : > { %538 = dma.hbm_to_vmem [thread:$0]  (!%p536_p6), %s175_s24, 2048, %s177_s28, [#allocation6], %s760_s9, %s760_s9, %s761_s10  }
  0x11   : > { %541 = dma.hbm_to_vmem [thread:$0]  (!%p536_p6), %s192_s6, 2048, %s194_s8, [#allocation6], %s760_s9, %s760_s9, %s761_s10  }
  0x12   : > { %p36_p8 = scmp.ne.s32.totalorder %s752_s20, %s748_s19  ;;  %p37_p9 = scmp.eq.s32.totalorder %s756_s21, 0 }
  0x13   : > { %p42_p10 = scmp.ne.s32.totalorder %s748_s19, %s744_s18  ;;  %p150_p13 = scmp.eq.s32.totalorder %s816_s25, 1 }
  0x14   : > { %s846_s15 = scalar_select %p27_p7, %s752_s20, %s29_s14  }
  0x15   : > { %p848_p11 = por %p37_p9, %p36_p8  ;;  %p854_p12 = por %p43_p1, %p42_p10 }
  0x16   : > { %p156_p0 = scmp.eq.s32.totalorder %s506_s11, 1  ;;  %p552_p2 = scmp.lt.s32.totalorder %s756_s21, 2 }
  0x17   : > { %s210_s22 = sand.u32 1, %s752_s20   ;;  %p861_p4 = por %p150_p13, %p36_p8 }
  0x18   : > { %p865_p6 = por %p156_p0, %p42_p10  ;;  %s511_s27 = sshll.u32 %s210_s22, 3 }
  0x19   : > { %s512_s28 = sshll.u32 %s756_s21, 3  ;;  %s214_s7 = scalar_lea.vmem [#allocation2], %s511_s27 }
  0x1a   : > { %s218_s6 = scalar_lea.hbm %s950_s0, %s512_s28  ;;  %s222_s8 = sshll.u32 %s214_s7, 4  ;;  %s223_s8 = int_to_ptr.vmem [resolvable:$true] %s222_s8 }
  0x1b   : > { %s220_s9 = sshll.u32 %s218_s6, 4  ;;  %p875_p7 = pnand %p552_p2, %p848_p11  ;;  %s221_s9 = int_to_ptr.hbm [resolvable:$true] %s220_s9 }
  0x1c   : > { %s211_s11 = scalar_lea.sflag [#allocation3], %s210_s22  ;;  %s656_s13 = sshra.s32 %s221_s9, 4  ;;  %s657_s13 = int_to_ptr.hbm [resolvable:$true] %s656_s13 }
  0x1d   : > { %s658_s14 = scalar_lea.hbm %s657_s13, 8  ;;  %p660_p9 = pneg %p875_p7 }
  0x1e   : > { %p659_p8 = scmp.ne.s32.totalorder %s657_s13, %s658_s14  ;;  %s663_s29 = scalar_lea.hbm %s950_s0, 16 }
  0x1f   : > { %p664_p11 = scmp.lt.s32.totalorder %s657_s13, %s950_s0  ;;  %p665_p0 = scmp.lt.s32.totalorder %s663_s29, %s658_s14 }
  0x20   : > { %p661_p10 = pnand %p660_p9, %p659_p8 }
  0x21   : > { %p666_p2 = por %p665_p0, %p664_p11 }
  0x22   : > { %p662_p13 = pneg %p661_p10 }
  0x24   : > { %p667_p5 = pnand %p666_p2, %p662_p13 }
  0x26   : > { %670 = shalt.err (!%p667_p5)
}
  0x27   : > { %545 = dma.hbm_to_vmem [thread:$0]  (!%p875_p7), %s221_s9, 128, %s223_s8, %s211_s11  }
  0x28   : > { %231 = sbr.rel (%p821_p3) target bundleno = 390 (0x186), region = 40  ;;  %s892_s22 = sand.u32 (!%p821_p3), 1, %s748_s19  }
  0x29   : > { %s514_s6 = sshll.u32 (!%p821_p3), %s892_s22, 3  ;;  %s234_s7 = scalar_lea.sflag (!%p821_p3), [#allocation3], %s892_s22 }
  0x2a   : > { %s898_s13 = scalar_lea.vmem (!%p821_p3), [#allocation2], %s514_s6 }
  0x2d   : > { %731 = dma.done.wait (%p854_p12), %s234_s7, 128  }
  0x2e   : > { %733 = vsyncadd (%p854_p12), %s234_s7, 4294967168 }
  0x2f   : > { %735 = dma.done.wait (%p43_p1), [#allocation6], 4096  }
  0x30   : > { %737 = vsyncadd (%p43_p1), [#allocation6], 4294963200  ;;  %v291_v0 = vld [vmem:[#allocation5 + $0x78] sm:$0xff]  ;;  %v290_v1 = vld [vmem:[#allocation5 + $0x70] sm:$0xff]  ;;  %s520_s8 = sshll.u32 %s816_s25, 3  ;;  %s274_s28 = scalar_lea.vmem [#allocation8], %s514_s6 }
  0x31   : > { %296 = vmatpush.msra.mxu0 %v291_v0  ;;  %v289_v2 = vld [vmem:[#allocation5 + $0x68] sm:$0xff]  ;;  %v288_v3 = vld [vmem:[#allocation5 + $0x60] sm:$0xff]  ;;  %v287_v4 = vld [vmem:[#allocation5 + $0x58] sm:$0xff]  ;;  %s412_s11 = scalar_lea.hbm %s955_s5, %s520_s8  ;;  %s414_s29 = sshll.u32 %s274_s28, 4  ;;  %s415_s29 = int_to_ptr.vmem [resolvable:$true] %s414_s29 }
  0x32   : > { %v286_v5 = vld [vmem:[#allocation5 + $0x50] sm:$0xff]  ;;  %v285_v6 = vld [vmem:[#allocation5 + $0x48] sm:$0xff]  ;;  %v284_v7 = vld [vmem:[#allocation5 + $0x40] sm:$0xff]  ;;  %s416_s30 = sshll.u32 %s412_s11, 4  ;;  %s402_s16 = scalar_lea.sflag [#allocation4], %s892_s22  ;;  %s417_s30 = int_to_ptr.hbm [resolvable:$true] %s416_s30 }
  0x33   : > { %297 = vmatpush.msra.mxu0 %v290_v1  ;;  %v283_v8 = vld [vmem:[#allocation5 + $0x38] sm:$0xff]  ;;  %v282_v9 = vld [vmem:[#allocation5 + $0x30] sm:$0xff]  ;;  %v281_v10 = vld [vmem:[#allocation5 + $0x28] sm:$0xff]  ;;  %s700_s25 = sshra.s32 %s417_s30, 4  ;;  %s706_s17 = scalar_lea.hbm %s955_s5, 16  ;;  %s701_s25 = int_to_ptr.hbm [resolvable:$true] %s700_s25 }
  0x34   : > { %v280_v11 = vld [vmem:[#allocation5 + $0x20] sm:$0xff]  ;;  %v279_v12 = vld [vmem:[#allocation5 + $0x18] sm:$0xff]  ;;  %v278_v13 = vld [vmem:[#allocation5 + $0x10] sm:$0xff]  ;;  %s702_s7 = scalar_lea.hbm %s701_s25, 8  ;;  %p707_p12 = scmp.lt.s32.totalorder %s701_s25, %s955_s5 }
  0x35   : > { %298 = vmatpush.msra.mxu0 %v289_v2  ;;  %v277_v14 = vld [vmem:[#allocation5 + $0x8] sm:$0xff]  ;;  %v276_v15 = vld [vmem:[#allocation5] sm:$0xff]  ;;  %v275_v16 = vld [vmem:[%s898_s13] sm:$0xff]  ;;  %p703_p1 = scmp.ne.s32.totalorder %s701_s25, %s702_s7  ;;  %p708_p7 = scmp.lt.s32.totalorder %s706_s17, %s702_s7 }
  0x36   : > { %v375_v17 = vld [vmem:[#allocation7 + $0x78] sm:$0xff]  ;;  %v374_v18 = vld [vmem:[#allocation7 + $0x70] sm:$0xff]  ;;  %v373_v19 = vld [vmem:[#allocation7 + $0x68] sm:$0xff] }
  0x37   : > { %299 = vmatpush.msra.mxu0 %v288_v3  ;;  %380 = vmatpush.msra.mxu1 %v375_v17  ;;  %v372_v20 = vld [vmem:[#allocation7 + $0x60] sm:$0xff]  ;;  %v592_v21 = vld [vmem:[%s952_s2] ss:$0 sm:$0xff]  ;;  %v371_v22 = vld [vmem:[#allocation7 + $0x58] sm:$0xff]  ;;  %p704_p3 = pnand %p703_p1, %p861_p4  ;;  %p709_p8 = por %p708_p7, %p707_p12 }
  0x38   : > { %v370_v23 = vld [vmem:[#allocation7 + $0x50] sm:$0xff]  ;;  %v369_v25 = vld [vmem:[#allocation7 + $0x48] sm:$0xff]  ;;  %v368_v27 = vld [vmem:[#allocation7 + $0x40] sm:$0xff] }
  0x39   : > { %300 = vmatpush.msra.mxu0 %v287_v4  ;;  %381 = vmatpush.msra.mxu1 %v374_v18  ;;  %v367_v29 = vld [vmem:[#allocation7 + $0x38] sm:$0xff]  ;;  %v366_v31 = vld [vmem:[#allocation7 + $0x30] sm:$0xff]  ;;  %v365_v33 = vld [vmem:[#allocation7 + $0x28] sm:$0xff]  ;;  %p705_p5 = pneg %p704_p3 }
  0x3a   : > { %v364_v36 = vld [vmem:[#allocation7 + $0x20] sm:$0xff]  ;;  %v363_v39 = vld [vmem:[#allocation7 + $0x18] sm:$0xff]  ;;  %v362_v42 = vld [vmem:[#allocation7 + $0x10] sm:$0xff] }
  0x3b   : > { %301 = vmatpush.msra.mxu0 %v286_v5  ;;  %382 = vmatpush.msra.mxu1 %v373_v19  ;;  %v361_v45 = vld [vmem:[#allocation7 + $0x8] sm:$0xff]  ;;  %v360_v47 = vld [vmem:[#allocation7] sm:$0xff]  ;;  %p710_p9 = pnand %p709_p8, %p705_p5 }
  0x3d   : > { %302 = vmatpush.msra.mxu0 %v285_v6  ;;  %383 = vmatpush.msra.mxu1 %v372_v20 }
  0x3f   : > { %303 = vmatpush.msra.mxu0 %v284_v7  ;;  %384 = vmatpush.msra.mxu1 %v371_v22 }
  0x41   : > { %304 = vmatpush.msra.mxu0 %v283_v8  ;;  %385 = vmatpush.msra.mxu1 %v370_v23 }
  0x43   : > { %305 = vmatpush.msra.mxu0 %v282_v9  ;;  %386 = vmatpush.msra.mxu1 %v369_v25 }
  0x45   : > { %306 = vmatpush.msra.mxu0 %v281_v10  ;;  %387 = vmatpush.msra.mxu1 %v368_v27 }
  0x47   : > { %307 = vmatpush.msra.mxu0 %v280_v11  ;;  %388 = vmatpush.msra.mxu1 %v367_v29  ;;  %v593_v11 = vld [vmem:[%s954_s4] ss:$0 sm:$0xff] }
  0x49   : > { %308 = vmatpush.msra.mxu0 %v279_v12  ;;  %389 = vmatpush.msra.mxu1 %v366_v31 }
  0x4b   : > { %309 = vmatpush.msra.mxu0 %v278_v13  ;;  %390 = vmatpush.msra.mxu1 %v365_v33 }
  0x4d   : > { %310 = vmatpush.msra.mxu0 %v277_v14  ;;  %391 = vmatpush.msra.mxu1 %v364_v36 }
  0x4f   : > { %311 = vmatpush.msra.mxu0 %v276_v15  ;;  %392 = vmatpush.msra.mxu1 %v363_v39 }
  0x50   : > { %312 = vmatmul.f32.vlgmr.msra.gmra.mxu0 %v275_v16 }
  0x51   : > { %393 = vmatpush.msra.mxu1 %v362_v42 }
  0x53   : > { %394 = vmatpush.msra.mxu1 %v361_v45 }
  0x55   : > { %395 = vmatpush.msra.mxu1 %v360_v47 }
  0xcd   : > { %v313_v24 = vpop.f32.mrf.mxu0 }
  0xce   : > { %v314_v26 = vadd.f32 %v592_v21, %v313_v24 }
  0xd0   : > { %v317_v28 = vmul.f32 0.70710677, %v314_v26  ;;  %v316_v8 = vmul.f32 0.5, %v314_v26 }
  0xd2   : > { %v318_v30 = vmul.f32 %v317_v28, %v317_v28 }
  0xd4   : > { %v319_v32 = vmin.f32 %v318_v30, 16.0 }
  0xd6   : > { %v320_v34 = vmul.f32 2.1237322e-06, %v319_v32  ;;  %v331_v35 = vmul.f32 3.8918573e-05, %v319_v32 }
  0xd8   : > { %v321_v37 = vadd.f32 0.00028619796, %v320_v34  ;;  %v332_v38 = vadd.f32 0.001143296, %v331_v35 }
  0xda   : > { %v322_v40 = vmul.f32 %v321_v37, %v319_v32  ;;  %v333_v41 = vmul.f32 %v332_v38, %v319_v32 }
  0xdc   : > { %v334_v43 = vadd.f32 0.014752088, %v333_v41  ;;  %v323_v44 = vadd.f32 0.0036580483, %v322_v40 }
  0xde   : > { %v335_v46 = vmul.f32 %v334_v43, %v319_v32  ;;  %v324_v49 = vmul.f32 %v323_v44, %v319_v32 }
  0xe0   : > { %v336_v48 = vadd.f32 0.112945676, %v335_v46  ;;  %v325_v52 = vadd.f32 0.05243302, %v324_v49 }
  0xe2   : > { %v337_v50 = vmul.f32 %v336_v48, %v319_v32  ;;  %v326_v55 = vmul.f32 %v325_v52, %v319_v32 }
  0xe4   : > { %v338_v51 = vadd.f32 0.4994258, %v337_v50  ;;  %v327_v56 = vadd.f32 0.18741608, %v326_v55 }
  0xe6   : > { %v339_v53 = vmul.f32 %v338_v51, %v319_v32  ;;  %v328_v58 = vmul.f32 %v327_v56, %v319_v32 }
  0xe8   : > { %v340_v54 = vadd.f32 1.0, %v339_v53  ;;  %v329_v62 = vadd.f32 1.1283791, %v328_v58 }
  0xea   : > { %594 = vrcp.f32 %v340_v54  ;;  %v352_v61 = vand.u32 2147483648, %v340_v54  ;;  %v350_v0 = vand.u32 2147483647, %v340_v54  ;;  %vm346_vm1 = vweird.f32 %v340_v54 }
  0xeb   : > { %v330_v3 = vmul.f32 %v329_v62, %v317_v28 }
  0xec   : > { %v353_v2 = vor.u32 1.1754944e-38, %v352_v61  ;;  %vm351_vm3 = vcmp.eq.f32.partialorder %v350_v0, 8.507059e+37 }
  0xf0   : > { %v595_v57 = vpop.eup %594 }
  0xf1   : > { %v342_v59 = vmul.f32 %v595_v57, %v340_v54  ;;  %vm347_vm0 = vweird.f32 %v595_v57 }
  0xf2   : > { %vm348_vm2 = vmor %vm346_vm1, %vm347_vm0 }
  0xf3   : > { %v343_v60 = vsub.f32 1.0, %v342_v59 }
  0xf5   : > { %v344_v63 = vmul.f32 %v595_v57, %v343_v60 }
  0xf7   : > { %v345_v1 = vadd.f32 %v595_v57, %v344_v63 }
  0xf9   : > { %v349_v4 = vsel %vm348_vm2, %v595_v57, %v345_v1 }
  0xfa   : > { %v354_v5 = vsel %vm351_vm3, %v353_v2, %v349_v4 }
  0xfb   : > { %v355_v6 = vmul.f32 %v354_v5, %v330_v3 }
  0xfd   : > { %v518_v7 = vclamps-f32 %v355_v6, 1.0 }
  0xff   : > { %v358_v9 = vadd.f32 1.0, %v518_v7 }
 0x101   : > { %v359_v10 = vmul.f32 %v358_v9, %v316_v8 }
 0x103   : > { %396 = vmatmul.f32.vlgmr.msra.gmra.mxu1 %v359_v10 }
 0x180   : > { %v397_v12 = vpop.f32.mrf.mxu1 }
 0x181   : > { %v398_v13 = vadd.f32 %v593_v11, %v397_v12 }
 0x183   : > { %400 = vst [vmem:[%s274_s28] sm:$0xff] %v398_v13 }
 0x184   : > { %713 = shalt.err (!%p710_p9)
}
 0x185   : > { %533 = dma.vmem_to_hbm [thread:$0]  (%p861_p4), %s415_s29, 128, %s417_s30, %s402_s16  }
 0x186 PF: > { %s428_s22 = sand.u32 1, %s744_s18   ;;  %p962_p10 = scmp.ge.s32.totalorder %s756_s21, 2 }
 0x187   : > { %s429_s9 = scalar_lea.sflag [#allocation4], %s428_s22 }
 0x188   : > { %p547_p13 = pnand %p962_p10, %p865_p6 }
 0x18a   : > { %p548_p11 = pneg %p547_p13 }
 0x18c   : > { %739 = dma.done.wait (%p548_p11), %s429_s9, 128  }
 0x18d   : > { %741 = vsyncadd (%p548_p11), %s429_s9, 4294967168  ;;  %p19_p0 = scmp.ge.s32.totalorder %s835_s12, 4   ;;  %s963_s18 = smov %s748_s19 }
 0x18e   : > { %s964_s19 = smov %s752_s20  ;;  %s965_s20 = smov %s846_s15 }
 0x18f   : > { %s966_s21 = smov %s835_s12  ;;  %21 = sbr.rel (!%p19_p0) target bundleno = 6 (0x6), region = 93 }
 0x194   :  { %435 = vsyncpa [#allocation3], 1 }
 0x195   :  { %437 = vsyncpa [#allocation3 + $0x1], 1 }
 0x196   :  { %438 = vsyncpa [#allocation6], 1 }
 0x197   :  { %439 = vsyncpa [#allocation4], 1 }
 0x198   :  { %441 = vsyncpa [#allocation4 + $0x1], 1 }

// kernel: tpu_custom_call.1
= control target key start
LH: loop header
LB: loop body
LE: loop exit
PB: predicated region body
PF: predicated region fallthrough
CT: control target
= control target key end

     0   :  { %10 = vsyncpa [#allocation3], 0  ;;  %s950_s0 = inlined_call_operand.hbm [shape: f32[16,128], index: 0, kind: input, shape index: {}]   ;;  %s951_s1 = inlined_call_operand.hbm [shape: f32[128,128], index: 1, kind: input, shape index: {}]   ;;  %s952_s2 = inlined_call_operand.vmem [shape: f32[1,128], index: 2, kind: input, shape index: {}]   ;;  %s953_s3 = inlined_call_operand.hbm [shape: f32[128,128], index: 3, kind: input, shape index: {}]   ;;  %s954_s4 = inlined_call_operand.vmem [shape: f32[1,128], index: 4, kind: input, shape index: {}]   ;;  %s955_s5 = inlined_call_operand.hbm [shape: f32[16,128], index: 5, kind: output, shape index: {}]  }
   0x1   :  { %12 = vsyncpa [#allocation3 + $0x1], 0 }
   0x2   :  { %13 = vsyncpa [#allocation6], 0 }
   0x3   :  { %14 = vsyncpa [#allocation4], 0 }
   0x4   :  { %16 = vsyncpa [#allocation4 + $0x1], 0  ;;  %s792_s18 = smov 0   ;;  %s794_s19 = smov 0  }
   0x5   :  { %s796_s20 = smov 0   ;;  %s798_s21 = smov 0  }
   0x6 LB: > { %s174_s24 = sshll.u32 %s951_s1, 4  ;;  %s816_s25 = sadd.s32 4294967295, %s756_s21   ;;  %s756_s21 = sphi %s798_s21, %s966_s21   ;;  %s752_s20 = sphi %s796_s20, %s965_s20   ;;  %s748_s19 = sphi %s794_s19, %s964_s19   ;;  %s744_s18 = sphi %s792_s18, %s963_s18   ;;  %s175_s24 = int_to_ptr.hbm [resolvable:$true] %s174_s24 }
   0x7   : > { %p507_p0 = scmp.ge.s32.totalorder %s756_s21, 1  ;;  %p43_p1 = scmp.eq.s32.totalorder %s816_s25, 0 }
   0x8   : > { %p163_p2 = scmp.lt.s32.totalorder %s756_s21, 3  ;;  %s758_s27 = smov [#allocation5]  }
   0x9   : > { %s176_s28 = sshll.u32 %s758_s27, 4  ;;  %s191_s6 = sshll.u32 %s953_s3, 4  ;;  %s177_s28 = int_to_ptr.vmem [resolvable:$true] %s176_s28  ;;  %s192_s6 = int_to_ptr.hbm [resolvable:$true] %s191_s6 }
   0xa   : > { %p821_p3 = pnand %p507_p0, %p163_p2  ;;  %s759_s7 = smov [#allocation7]  }
   0xb   : > { %s193_s8 = sshll.u32 %s759_s7, 4  ;;  %s760_s9 = smov 128   ;;  %s194_s8 = int_to_ptr.vmem [resolvable:$true] %s193_s8 }
   0xc   : > { %p535_p4 = pneg %p821_p3  ;;  %s761_s10 = smov 8  }
   0xd   : > { %s506_s11 = sadd.s32 4294967294, %s756_s21   ;;  %s835_s12 = sadd.s32 1, %s756_s21  }
   0xe   : > { %p536_p6 = pnand %p535_p4, %p43_p1  ;;  %s26_s13 = ssub.s32 %s756_s21, %s835_s12 }
   0xf   : > { %s29_s14 = sadd.s32 1, %s752_s20  ;;  %p27_p7 = scmp.eq.s32.totalorder %s26_s13, 0 }
  0x10   : > { %538 = dma.hbm_to_vmem [thread:$0]  (!%p536_p6), %s175_s24, 2048, %s177_s28, [#allocation6], %s760_s9, %s760_s9, %s761_s10  }
  0x11   : > { %541 = dma.hbm_to_vmem [thread:$0]  (!%p536_p6), %s192_s6, 2048, %s194_s8, [#allocation6], %s760_s9, %s760_s9, %s761_s10  }
  0x12   : > { %p36_p8 = scmp.ne.s32.totalorder %s752_s20, %s748_s19  ;;  %p37_p9 = scmp.eq.s32.totalorder %s756_s21, 0 }
  0x13   : > { %p42_p10 = scmp.ne.s32.totalorder %s748_s19, %s744_s18  ;;  %p150_p13 = scmp.eq.s32.totalorder %s816_s25, 1 }
  0x14   : > { %s846_s15 = scalar_select %p27_p7, %s752_s20, %s29_s14  }
  0x15   : > { %p848_p11 = por %p37_p9, %p36_p8  ;;  %p854_p12 = por %p43_p1, %p42_p10 }
  0x16   : > { %p156_p0 = scmp.eq.s32.totalorder %s506_s11, 1  ;;  %p552_p2 = scmp.lt.s32.totalorder %s756_s21, 2 }
  0x17   : > { %s210_s22 = sand.u32 1, %s752_s20   ;;  %p861_p4 = por %p150_p13, %p36_p8 }
  0x18   : > { %p865_p6 = por %p156_p0, %p42_p10  ;;  %s511_s27 = sshll.u32 %s210_s22, 3 }
  0x19   : > { %s512_s28 = sshll.u32 %s756_s21, 3  ;;  %s214_s7 = scalar_lea.vmem [#allocation2], %s511_s27 }
  0x1a   : > { %s218_s6 = scalar_lea.hbm %s950_s0, %s512_s28  ;;  %s222_s8 = sshll.u32 %s214_s7, 4  ;;  %s223_s8 = int_to_ptr.vmem [resolvable:$true] %s222_s8 }
  0x1b   : > { %s220_s9 = sshll.u32 %s218_s6, 4  ;;  %p875_p7 = pnand %p552_p2, %p848_p11  ;;  %s221_s9 = int_to_ptr.hbm [resolvable:$true] %s220_s9 }
  0x1c   : > { %s211_s11 = scalar_lea.sflag [#allocation3], %s210_s22  ;;  %s656_s13 = sshra.s32 %s221_s9, 4  ;;  %s657_s13 = int_to_ptr.hbm [resolvable:$true] %s656_s13 }
  0x1d   : > { %s658_s14 = scalar_lea.hbm %s657_s13, 8  ;;  %p660_p9 = pneg %p875_p7 }
  0x1e   : > { %p659_p8 = scmp.ne.s32.totalorder %s657_s13, %s658_s14  ;;  %s663_s29 = scalar_lea.hbm %s950_s0, 16 }
  0x1f   : > { %p664_p11 = scmp.lt.s32.totalorder %s657_s13, %s950_s0  ;;  %p665_p0 = scmp.lt.s32.totalorder %s663_s29, %s658_s14 }
  0x20   : > { %p661_p10 = pnand %p660_p9, %p659_p8 }
  0x21   : > { %p666_p2 = por %p665_p0, %p664_p11 }
  0x22   : > { %p662_p13 = pneg %p661_p10 }
  0x24   : > { %p667_p5 = pnand %p666_p2, %p662_p13 }
  0x26   : > { %670 = shalt.err (!%p667_p5)
}
  0x27   : > { %545 = dma.hbm_to_vmem [thread:$0]  (!%p875_p7), %s221_s9, 128, %s223_s8, %s211_s11  }
  0x28   : > { %231 = sbr.rel (%p821_p3) target bundleno = 390 (0x186), region = 40  ;;  %s892_s22 = sand.u32 (!%p821_p3), 1, %s748_s19  }
  0x29   : > { %s514_s6 = sshll.u32 (!%p821_p3), %s892_s22, 3  ;;  %s234_s7 = scalar_lea.sflag (!%p821_p3), [#allocation3], %s892_s22 }
  0x2a   : > { %s898_s13 = scalar_lea.vmem (!%p821_p3), [#allocation2], %s514_s6 }
  0x2d   : > { %731 = dma.done.wait (%p854_p12), %s234_s7, 128  }
  0x2e   : > { %733 = vsyncadd (%p854_p12), %s234_s7, 4294967168 }
  0x2f   : > { %735 = dma.done.wait (%p43_p1), [#allocation6], 4096  }
  0x30   : > { %737 = vsyncadd (%p43_p1), [#allocation6], 4294963200  ;;  %v291_v0 = vld [vmem:[#allocation5 + $0x78] sm:$0xff]  ;;  %v290_v1 = vld [vmem:[#allocation5 + $0x70] sm:$0xff]  ;;  %s520_s8 = sshll.u32 %s816_s25, 3  ;;  %s274_s28 = scalar_lea.vmem [#allocation8], %s514_s6 }
  0x31   : > { %296 = vmatpush.msra.mxu0 %v291_v0  ;;  %v289_v2 = vld [vmem:[#allocation5 + $0x68] sm:$0xff]  ;;  %v288_v3 = vld [vmem:[#allocation5 + $0x60] sm:$0xff]  ;;  %v287_v4 = vld [vmem:[#allocation5 + $0x58] sm:$0xff]  ;;  %s412_s11 = scalar_lea.hbm %s955_s5, %s520_s8  ;;  %s414_s29 = sshll.u32 %s274_s28, 4  ;;  %s415_s29 = int_to_ptr.vmem [resolvable:$true] %s414_s29 }
  0x32   : > { %v286_v5 = vld [vmem:[#allocation5 + $0x50] sm:$0xff]  ;;  %v285_v6 = vld [vmem:[#allocation5 + $0x48] sm:$0xff]  ;;  %v284_v7 = vld [vmem:[#allocation5 + $0x40] sm:$0xff]  ;;  %s416_s30 = sshll.u32 %s412_s11, 4  ;;  %s402_s16 = scalar_lea.sflag [#allocation4], %s892_s22  ;;  %s417_s30 = int_to_ptr.hbm [resolvable:$true] %s416_s30 }
  0x33   : > { %297 = vmatpush.msra.mxu0 %v290_v1  ;;  %v283_v8 = vld [vmem:[#allocation5 + $0x38] sm:$0xff]  ;;  %v282_v9 = vld [vmem:[#allocation5 + $0x30] sm:$0xff]  ;;  %v281_v10 = vld [vmem:[#allocation5 + $0x28] sm:$0xff]  ;;  %s700_s25 = sshra.s32 %s417_s30, 4  ;;  %s706_s17 = scalar_lea.hbm %s955_s5, 16  ;;  %s701_s25 = int_to_ptr.hbm [resolvable:$true] %s700_s25 }
  0x34   : > { %v280_v11 = vld [vmem:[#allocation5 + $0x20] sm:$0xff]  ;;  %v279_v12 = vld [vmem:[#allocation5 + $0x18] sm:$0xff]  ;;  %v278_v13 = vld [vmem:[#allocation5 + $0x10] sm:$0xff]  ;;  %s702_s7 = scalar_lea.hbm %s701_s25, 8  ;;  %p707_p12 = scmp.lt.s32.totalorder %s701_s25, %s955_s5 }
  0x35   : > { %298 = vmatpush.msra.mxu0 %v289_v2  ;;  %v277_v14 = vld [vmem:[#allocation5 + $0x8] sm:$0xff]  ;;  %v276_v15 = vld [vmem:[#allocation5] sm:$0xff]  ;;  %v275_v16 = vld [vmem:[%s898_s13] sm:$0xff]  ;;  %p703_p1 = scmp.ne.s32.totalorder %s701_s25, %s702_s7  ;;  %p708_p7 = scmp.lt.s32.totalorder %s706_s17, %s702_s7 }
  0x36   : > { %v375_v17 = vld [vmem:[#allocation7 + $0x78] sm:$0xff]  ;;  %v374_v18 = vld [vmem:[#allocation7 + $0x70] sm:$0xff]  ;;  %v373_v19 = vld [vmem:[#allocation7 + $0x68] sm:$0xff] }
  0x37   : > { %299 = vmatpush.msra.mxu0 %v288_v3  ;;  %380 = vmatpush.msra.mxu1 %v375_v17  ;;  %v372_v20 = vld [vmem:[#allocation7 + $0x60] sm:$0xff]  ;;  %v592_v21 = vld [vmem:[%s952_s2] ss:$0 sm:$0xff]  ;;  %v371_v22 = vld [vmem:[#allocation7 + $0x58] sm:$0xff]  ;;  %p704_p3 = pnand %p703_p1, %p861_p4  ;;  %p709_p8 = por %p708_p7, %p707_p12 }
  0x38   : > { %v370_v23 = vld [vmem:[#allocation7 + $0x50] sm:$0xff]  ;;  %v369_v25 = vld [vmem:[#allocation7 + $0x48] sm:$0xff]  ;;  %v368_v27 = vld [vmem:[#allocation7 + $0x40] sm:$0xff] }
  0x39   : > { %300 = vmatpush.msra.mxu0 %v287_v4  ;;  %381 = vmatpush.msra.mxu1 %v374_v18  ;;  %v367_v29 = vld [vmem:[#allocation7 + $0x38] sm:$0xff]  ;;  %v366_v31 = vld [vmem:[#allocation7 + $0x30] sm:$0xff]  ;;  %v365_v33 = vld [vmem:[#allocation7 + $0x28] sm:$0xff]  ;;  %p705_p5 = pneg %p704_p3 }
  0x3a   : > { %v364_v36 = vld [vmem:[#allocation7 + $0x20] sm:$0xff]  ;;  %v363_v39 = vld [vmem:[#allocation7 + $0x18] sm:$0xff]  ;;  %v362_v42 = vld [vmem:[#allocation7 + $0x10] sm:$0xff] }
  0x3b   : > { %301 = vmatpush.msra.mxu0 %v286_v5  ;;  %382 = vmatpush.msra.mxu1 %v373_v19  ;;  %v361_v45 = vld [vmem:[#allocation7 + $0x8] sm:$0xff]  ;;  %v360_v47 = vld [vmem:[#allocation7] sm:$0xff]  ;;  %p710_p9 = pnand %p709_p8, %p705_p5 }
  0x3d   : > { %302 = vmatpush.msra.mxu0 %v285_v6  ;;  %383 = vmatpush.msra.mxu1 %v372_v20 }
  0x3f   : > { %303 = vmatpush.msra.mxu0 %v284_v7  ;;  %384 = vmatpush.msra.mxu1 %v371_v22 }
  0x41   : > { %304 = vmatpush.msra.mxu0 %v283_v8  ;;  %385 = vmatpush.msra.mxu1 %v370_v23 }
  0x43   : > { %305 = vmatpush.msra.mxu0 %v282_v9  ;;  %386 = vmatpush.msra.mxu1 %v369_v25 }
  0x45   : > { %306 = vmatpush.msra.mxu0 %v281_v10  ;;  %387 = vmatpush.msra.mxu1 %v368_v27 }
  0x47   : > { %307 = vmatpush.msra.mxu0 %v280_v11  ;;  %388 = vmatpush.msra.mxu1 %v367_v29  ;;  %v593_v11 = vld [vmem:[%s954_s4] ss:$0 sm:$0xff] }
  0x49   : > { %308 = vmatpush.msra.mxu0 %v279_v12  ;;  %389 = vmatpush.msra.mxu1 %v366_v31 }
  0x4b   : > { %309 = vmatpush.msra.mxu0 %v278_v13  ;;  %390 = vmatpush.msra.mxu1 %v365_v33 }
  0x4d   : > { %310 = vmatpush.msra.mxu0 %v277_v14  ;;  %391 = vmatpush.msra.mxu1 %v364_v36 }
  0x4f   : > { %311 = vmatpush.msra.mxu0 %v276_v15  ;;  %392 = vmatpush.msra.mxu1 %v363_v39 }
  0x50   : > { %312 = vmatmul.f32.vlgmr.msra.gmra.mxu0 %v275_v16 }
  0x51   : > { %393 = vmatpush.msra.mxu1 %v362_v42 }
  0x53   : > { %394 = vmatpush.msra.mxu1 %v361_v45 }
  0x55   : > { %395 = vmatpush.msra.mxu1 %v360_v47 }
  0xcd   : > { %v313_v24 = vpop.f32.mrf.mxu0 }
  0xce   : > { %v314_v26 = vadd.f32 %v592_v21, %v313_v24 }
  0xd0   : > { %v317_v28 = vmul.f32 0.70710677, %v314_v26  ;;  %v316_v8 = vmul.f32 0.5, %v314_v26 }
  0xd2   : > { %v318_v30 = vmul.f32 %v317_v28, %v317_v28 }
  0xd4   : > { %v319_v32 = vmin.f32 %v318_v30, 16.0 }
  0xd6   : > { %v320_v34 = vmul.f32 2.1237322e-06, %v319_v32  ;;  %v331_v35 = vmul.f32 3.8918573e-05, %v319_v32 }
  0xd8   : > { %v321_v37 = vadd.f32 0.00028619796, %v320_v34  ;;  %v332_v38 = vadd.f32 0.001143296, %v331_v35 }
  0xda   : > { %v322_v40 = vmul.f32 %v321_v37, %v319_v32  ;;  %v333_v41 = vmul.f32 %v332_v38, %v319_v32 }
  0xdc   : > { %v334_v43 = vadd.f32 0.014752088, %v333_v41  ;;  %v323_v44 = vadd.f32 0.0036580483, %v322_v40 }
  0xde   : > { %v335_v46 = vmul.f32 %v334_v43, %v319_v32  ;;  %v324_v49 = vmul.f32 %v323_v44, %v319_v32 }
  0xe0   : > { %v336_v48 = vadd.f32 0.112945676, %v335_v46  ;;  %v325_v52 = vadd.f32 0.05243302, %v324_v49 }
  0xe2   : > { %v337_v50 = vmul.f32 %v336_v48, %v319_v32  ;;  %v326_v55 = vmul.f32 %v325_v52, %v319_v32 }
  0xe4   : > { %v338_v51 = vadd.f32 0.4994258, %v337_v50  ;;  %v327_v56 = vadd.f32 0.18741608, %v326_v55 }
  0xe6   : > { %v339_v53 = vmul.f32 %v338_v51, %v319_v32  ;;  %v328_v58 = vmul.f32 %v327_v56, %v319_v32 }
  0xe8   : > { %v340_v54 = vadd.f32 1.0, %v339_v53  ;;  %v329_v62 = vadd.f32 1.1283791, %v328_v58 }
  0xea   : > { %594 = vrcp.f32 %v340_v54  ;;  %v352_v61 = vand.u32 2147483648, %v340_v54  ;;  %v350_v0 = vand.u32 2147483647, %v340_v54  ;;  %vm346_vm1 = vweird.f32 %v340_v54 }
  0xeb   : > { %v330_v3 = vmul.f32 %v329_v62, %v317_v28 }
  0xec   : > { %v353_v2 = vor.u32 1.1754944e-38, %v352_v61  ;;  %vm351_vm3 = vcmp.eq.f32.partialorder %v350_v0, 8.507059e+37 }
  0xf0   : > { %v595_v57 = vpop.eup %594 }
  0xf1   : > { %v342_v59 = vmul.f32 %v595_v57, %v340_v54  ;;  %vm347_vm0 = vweird.f32 %v595_v57 }
  0xf2   : > { %vm348_vm2 = vmor %vm346_vm1, %vm347_vm0 }
  0xf3   : > { %v343_v60 = vsub.f32 1.0, %v342_v59 }
  0xf5   : > { %v344_v63 = vmul.f32 %v595_v57, %v343_v60 }
  0xf7   : > { %v345_v1 = vadd.f32 %v595_v57, %v344_v63 }
  0xf9   : > { %v349_v4 = vsel %vm348_vm2, %v595_v57, %v345_v1 }
  0xfa   : > { %v354_v5 = vsel %vm351_vm3, %v353_v2, %v349_v4 }
  0xfb   : > { %v355_v6 = vmul.f32 %v354_v5, %v330_v3 }
  0xfd   : > { %v518_v7 = vclamps-f32 %v355_v6, 1.0 }
  0xff   : > { %v358_v9 = vadd.f32 1.0, %v518_v7 }
 0x101   : > { %v359_v10 = vmul.f32 %v358_v9, %v316_v8 }
 0x103   : > { %396 = vmatmul.f32.vlgmr.msra.gmra.mxu1 %v359_v10 }
 0x180   : > { %v397_v12 = vpop.f32.mrf.mxu1 }
 0x181   : > { %v398_v13 = vadd.f32 %v593_v11, %v397_v12 }
 0x183   : > { %400 = vst [vmem:[%s274_s28] sm:$0xff] %v398_v13 }
 0x184   : > { %713 = shalt.err (!%p710_p9)
}
 0x185   : > { %533 = dma.vmem_to_hbm [thread:$0]  (%p861_p4), %s415_s29, 128, %s417_s30, %s402_s16  }
 0x186 PF: > { %s428_s22 = sand.u32 1, %s744_s18   ;;  %p962_p10 = scmp.ge.s32.totalorder %s756_s21, 2 }
 0x187   : > { %s429_s9 = scalar_lea.sflag [#allocation4], %s428_s22 }
 0x188   : > { %p547_p13 = pnand %p962_p10, %p865_p6 }
 0x18a   : > { %p548_p11 = pneg %p547_p13 }
 0x18c   : > { %739 = dma.done.wait (%p548_p11), %s429_s9, 128  }
 0x18d   : > { %741 = vsyncadd (%p548_p11), %s429_s9, 4294967168  ;;  %p19_p0 = scmp.ge.s32.totalorder %s835_s12, 4   ;;  %s963_s18 = smov %s748_s19 }
 0x18e   : > { %s964_s19 = smov %s752_s20  ;;  %s965_s20 = smov %s846_s15 }
 0x18f   : > { %s966_s21 = smov %s835_s12  ;;  %21 = sbr.rel (!%p19_p0) target bundleno = 6 (0x6), region = 93 }
 0x194   :  { %435 = vsyncpa [#allocation3], 1 }
 0x195   :  { %437 = vsyncpa [#allocation3 + $0x1], 1 }
 0x196   :  { %438 = vsyncpa [#allocation6], 1 }
 0x197   :  { %439 = vsyncpa [#allocation4], 1 }
 0x198   :  { %441 = vsyncpa [#allocation4 + $0x1], 1 }

</bundles_post_ra>
